<compile_context>
chip_gen: v7x
topology: tpu7x:2x2x1
jax: 0.10.0
libtpu: 0.0.40
codegen_flags: <defaults>
</compile_context>

<pallas_src>
import jax
import jax.numpy as jnp
from jax.experimental import pallas as pl
from jax.experimental.pallas import tpu as pltpu


def _qfunc_kernel(obs_ref, act_ref, w1o_ref, w1a_ref, b1_ref,
                  w2_ref, b2_ref, w3_ref, b3_ref, o_ref):
    # ---- Layer 1: concat fused via split-K: h = obs@W1o + act@W1a + b1, ReLU ----
    h = jnp.dot(obs_ref[...], w1o_ref[...], preferred_element_type=jnp.float32)
    h = h + jnp.dot(act_ref[...], w1a_ref[...], preferred_element_type=jnp.float32)
    h = jnp.maximum(h + b1_ref[...], 0.0)                      # f32 epilogue
    # ---- Layer 2: Linear + ReLU (bf16 MXU operands, f32 accumulate) ----
    h = jnp.dot(h.astype(w2_ref.dtype), w2_ref[...],
                preferred_element_type=jnp.float32)
    h = jnp.maximum(h + b2_ref[...], 0.0)
    # ---- Layer 3 (output width 1): VPU multiply + lane reduce, not an N=1 matmul ----
    w3_row = w3_ref[...].astype(jnp.float32)                   # (1, H2)
    q = jnp.sum(h * w3_row, axis=-1, keepdims=True)            # (TM, 1)
    q = q + b3_ref[0, 0]                                       # scalar bias from SMEM
    o_ref[...] = q.astype(o_ref.dtype)


def mlp_q_function(obs, act, params, *, compute_dtype=jnp.bfloat16, max_tile_m=512):
    """Fused Q-function forward. obs: (B, obs_dim), act: (B, act_dim) -> (B,)."""
    w1, b1, w2, b2, w3, b3 = params
    B, obs_dim = obs.shape
    act_dim = act.shape[-1]
    h1 = w1.shape[-1]
    h2 = w2.shape[-1]

    # Split W1 so concat([obs, act]) never materializes; cast the B-scaled
    # inputs and the weights to bf16 (halves HBM/DMA bytes, native MXU dtype).
    w1o = w1[:obs_dim].astype(compute_dtype)
    w1a = w1[obs_dim:].astype(compute_dtype)
    w2c = w2.astype(compute_dtype)
    w3_row = w3.T.astype(compute_dtype)          # (1, h2) row vector for the VPU reduce
    obs_c = obs.astype(compute_dtype)
    act_c = act.astype(compute_dtype)

    # Batch tile: full batch if small (always a legal block: equals array dim),
    # otherwise 512 rows (multiple of 8) -> pipelined + sharded across TCs.
    tm = B if B <= max_tile_m else max_tile_m
    grid = (pl.cdiv(B, tm),)

    q = pl.pallas_call(
        _qfunc_kernel,
        grid=grid,
        in_specs=[
            pl.BlockSpec((tm, obs_dim), lambda i: (i, 0)),           # obs tile
            pl.BlockSpec((tm, act_dim), lambda i: (i, 0)),           # act tile
            pl.BlockSpec((obs_dim, h1), lambda i: (0, 0)),           # W1_obs (resident)
            pl.BlockSpec((act_dim, h1), lambda i: (0, 0)),           # W1_act (resident)
            pl.BlockSpec((1, h1), lambda i: (0, 0)),                 # b1
            pl.BlockSpec((h1, h2), lambda i: (0, 0)),                # W2 (resident)
            pl.BlockSpec((1, h2), lambda i: (0, 0)),                 # b2
            pl.BlockSpec((1, h2), lambda i: (0, 0)),                 # W3^T row
            pl.BlockSpec((1, 1), lambda i: (0, 0),
                         memory_space=pltpu.MemorySpace.SMEM),       # b3 scalar
        ],
        out_specs=pl.BlockSpec((tm, 1), lambda i: (i, 0)),
        out_shape=jax.ShapeDtypeStruct((B, 1), jnp.float32),
        compiler_params=pltpu.CompilerParams(
            dimension_semantics=("parallel",),        # v7x: shard batch over 2 TCs
            vmem_limit_bytes=32 * 1024 * 1024,        # fits v7x's 64 MiB VMEM comfortably
        ),
    )(obs_c, act_c, w1o, w1a, b1, w2c, b2, w3_row, b3)
    return jnp.squeeze(q, -1)


def init_params(key, obs_dim, act_dim, hidden_sizes):
    """Deterministic synthetic parameters with the same shapes as the PyTorch module."""
    sizes = [obs_dim + act_dim] + list(hidden_sizes) + [1]
    params = []
    for j in range(len(sizes) - 1):
        key, kw, kb = jax.random.split(key, 3)
        fan_in = sizes[j]
        bound = 1.0 / jnp.sqrt(fan_in)
        # stored as (in, out); biases kept 2-D (1, out) for clean layouts
        w = jax.random.uniform(kw, (sizes[j], sizes[j + 1]), jnp.float32, -bound, bound)
        b = jax.random.uniform(kb, (1, sizes[j + 1]), jnp.float32, -bound, bound)
        params += [w, b]
    return tuple(params)


def _reference_matched(obs, act, params, compute_dtype=jnp.bfloat16):
    """Pure-JAX reference mimicking the kernel's bf16-in / f32-accumulate precision."""
    w1, b1, w2, b2, w3, b3 = params
    obs_dim = obs.shape[-1]
    o = obs.astype(compute_dtype)
    a = act.astype(compute_dtype)
    h = (jnp.dot(o, w1[:obs_dim].astype(compute_dtype), preferred_element_type=jnp.float32)
         + jnp.dot(a, w1[obs_dim:].astype(compute_dtype), preferred_element_type=jnp.float32))
    h = jnp.maximum(h + b1, 0.0)
    h = jnp.dot(h.astype(compute_dtype), w2.astype(compute_dtype),
                preferred_element_type=jnp.float32)
    h = jnp.maximum(h + b2, 0.0)
    q = h @ w3.astype(compute_dtype).astype(jnp.float32) + b3
    return jnp.squeeze(q, -1)


def _reference_f32(obs, act, params):
    w1, b1, w2, b2, w3, b3 = params
    x = jnp.concatenate([obs, act], axis=-1)
    h = jnp.maximum(x @ w1 + b1, 0.0)
    h = jnp.maximum(h @ w2 + b2, 0.0)
    return jnp.squeeze(h @ w3 + b3, -1)


if __name__ == "__main__":
    B, obs_dim, act_dim = 8, 16, 16
    hidden_sizes = (32, 32)

    key = jax.random.PRNGKey(0)
    k_obs, k_act, k_params = jax.random.split(key, 3)
    obs = jax.random.normal(k_obs, (B, obs_dim), jnp.float32)
    act = jax.random.normal(k_act, (B, act_dim), jnp.float32)
    params = init_params(k_params, obs_dim, act_dim, hidden_sizes)

    q = mlp_q_function(obs, act, params)
    q = jax.block_until_ready(q)
    assert q.shape == (B,), q.shape

    q_ref = _reference_matched(obs, act, params)
    assert jnp.allclose(q, q_ref, atol=1e-4, rtol=1e-4), (q, q_ref)

    q_ref32 = _reference_f32(obs, act, params)
    assert jnp.allclose(q, q_ref32, atol=5e-2, rtol=5e-2), (q, q_ref32)

    print("KERNEL_OK")
</pallas_src>

<mosaic_0001>
module attributes {stable_mosaic.version = 11 : i64} {
  func.func @_qfunc_kernel(%arg0: i32, %arg1: memref<8x16xbf16, #tpu.memory_space<vmem>>, %arg2: memref<8x16xbf16, #tpu.memory_space<vmem>>, %arg3: memref<16x32xbf16, #tpu.memory_space<vmem>>, %arg4: memref<16x32xbf16, #tpu.memory_space<vmem>>, %arg5: memref<1x32xf32, #tpu.memory_space<vmem>>, %arg6: memref<32x32xbf16, #tpu.memory_space<vmem>>, %arg7: memref<1x32xf32, #tpu.memory_space<vmem>>, %arg8: memref<1x32xbf16, #tpu.memory_space<vmem>>, %arg9: memref<1x1xf32, #tpu.memory_space<smem>>, %arg10: memref<8x1xf32, #tpu.memory_space<vmem>>) attributes {dimension_semantics = [#tpu.dimension_semantics<parallel>], iteration_bounds = array<i64: 1>, scalar_prefetch = 0 : i64, scratch_operands = 0 : i64, tpu.core_type = #tpu.core_type<tc>, window_params = [{transform_indices = @transform_0, window_bounds = array<i64: 8, 16>}, {transform_indices = @transform_1, window_bounds = array<i64: 8, 16>}, {pipeline_mode = #tpu.pipeline_mode<synchronous>, transform_indices = @transform_2, window_bounds = array<i64: 16, 32>}, {pipeline_mode = #tpu.pipeline_mode<synchronous>, transform_indices = @transform_3, window_bounds = array<i64: 16, 32>}, {pipeline_mode = #tpu.pipeline_mode<synchronous>, transform_indices = @transform_4, window_bounds = array<i64: 1, 32>}, {pipeline_mode = #tpu.pipeline_mode<synchronous>, transform_indices = @transform_5, window_bounds = array<i64: 32, 32>}, {pipeline_mode = #tpu.pipeline_mode<synchronous>, transform_indices = @transform_6, window_bounds = array<i64: 1, 32>}, {pipeline_mode = #tpu.pipeline_mode<synchronous>, transform_indices = @transform_7, window_bounds = array<i64: 1, 32>}, {transform_indices = @transform_8, window_bounds = array<i64: 1, 1>}, {transform_indices = @transform_9, window_bounds = array<i64: 8, 1>}]} {
    %c0 = arith.constant 0 : index
    %c0_0 = arith.constant 0 : index
    %0 = vector.load %arg1[%c0, %c0_0] : memref<8x16xbf16, #tpu.memory_space<vmem>>, vector<8x16xbf16>
    %c0_1 = arith.constant 0 : index
    %c0_2 = arith.constant 0 : index
    %1 = vector.load %arg3[%c0_1, %c0_2] : memref<16x32xbf16, #tpu.memory_space<vmem>>, vector<16x32xbf16>
    %cst = arith.constant dense<0.000000e+00> : vector<8x32xf32>
    %2 = tpu.matmul %0, %1, %cst {dimension_numbers = #tpu.dot_dimension_numbers<[1], [0], [0], [1], [0, 0, 1, 1], [], []>} : vector<8x16xbf16>, vector<16x32xbf16>, vector<8x32xf32> -> vector<8x32xf32>
    %c0_3 = arith.constant 0 : index
    %c0_4 = arith.constant 0 : index
    %3 = vector.load %arg2[%c0_3, %c0_4] : memref<8x16xbf16, #tpu.memory_space<vmem>>, vector<8x16xbf16>
    %c0_5 = arith.constant 0 : index
    %c0_6 = arith.constant 0 : index
    %4 = vector.load %arg4[%c0_5, %c0_6] : memref<16x32xbf16, #tpu.memory_space<vmem>>, vector<16x32xbf16>
    %cst_7 = arith.constant dense<0.000000e+00> : vector<8x32xf32>
    %5 = tpu.matmul %3, %4, %cst_7 {dimension_numbers = #tpu.dot_dimension_numbers<[1], [0], [0], [1], [0, 0, 1, 1], [], []>} : vector<8x16xbf16>, vector<16x32xbf16>, vector<8x32xf32> -> vector<8x32xf32>
    %6 = arith.addf %2, %5 : vector<8x32xf32>
    %c0_8 = arith.constant 0 : index
    %c0_9 = arith.constant 0 : index
    %7 = vector.load %arg5[%c0_8, %c0_9] : memref<1x32xf32, #tpu.memory_space<vmem>>, vector<1x32xf32>
    %8 = vector.broadcast %7 : vector<1x32xf32> to vector<8x32xf32>
    %9 = arith.addf %6, %8 : vector<8x32xf32>
    %cst_10 = arith.constant 0.000000e+00 : f32
    %10 = vector.broadcast %cst_10 : f32 to vector<8x32xf32>
    %11 = arith.maximumf %9, %10 : vector<8x32xf32>
    %12 = arith.truncf %11 : vector<8x32xf32> to vector<8x32xbf16>
    %c0_11 = arith.constant 0 : index
    %c0_12 = arith.constant 0 : index
    %13 = vector.load %arg6[%c0_11, %c0_12] : memref<32x32xbf16, #tpu.memory_space<vmem>>, vector<32x32xbf16>
    %cst_13 = arith.constant dense<0.000000e+00> : vector<8x32xf32>
    %14 = tpu.matmul %12, %13, %cst_13 {dimension_numbers = #tpu.dot_dimension_numbers<[1], [0], [0], [1], [0, 0, 1, 1], [], []>} : vector<8x32xbf16>, vector<32x32xbf16>, vector<8x32xf32> -> vector<8x32xf32>
    %c0_14 = arith.constant 0 : index
    %c0_15 = arith.constant 0 : index
    %15 = vector.load %arg7[%c0_14, %c0_15] : memref<1x32xf32, #tpu.memory_space<vmem>>, vector<1x32xf32>
    %16 = vector.broadcast %15 : vector<1x32xf32> to vector<8x32xf32>
    %17 = arith.addf %14, %16 : vector<8x32xf32>
    %cst_16 = arith.constant 0.000000e+00 : f32
    %18 = vector.broadcast %cst_16 : f32 to vector<8x32xf32>
    %19 = arith.maximumf %17, %18 : vector<8x32xf32>
    %c0_17 = arith.constant 0 : index
    %c0_18 = arith.constant 0 : index
    %20 = vector.load %arg8[%c0_17, %c0_18] : memref<1x32xbf16, #tpu.memory_space<vmem>>, vector<1x32xbf16>
    %21 = arith.extf %20 : vector<1x32xbf16> to vector<1x32xf32>
    %22 = vector.broadcast %21 : vector<1x32xf32> to vector<8x32xf32>
    %23 = arith.mulf %19, %22 : vector<8x32xf32>
    %cst_19 = arith.constant dense<0.000000e+00> : vector<8xf32>
    %24 = vector.multi_reduction <add>, %23, %cst_19 [1] : vector<8x32xf32> to vector<8xf32>
    %25 = vector.shape_cast %24 : vector<8xf32> to vector<8x1xf32>
    %c0_20 = arith.constant 0 : index
    %c0_21 = arith.constant 0 : index
    %26 = memref.load %arg9[%c0_20, %c0_21] : memref<1x1xf32, #tpu.memory_space<smem>>
    %27 = vector.broadcast %26 : f32 to vector<8x1xf32>
    %28 = arith.addf %25, %27 : vector<8x1xf32>
    %c0_22 = arith.constant 0 : index
    %c0_23 = arith.constant 0 : index
    %29 = vector.load %arg10[%c0_22, %c0_23] : memref<8x1xf32, #tpu.memory_space<vmem>>, vector<8x1xf32>
    tpu.vector_store %arg10[%c0_22, %c0_23], %28 {strides = array<i32>} : memref<8x1xf32, #tpu.memory_space<vmem>>, vector<8x1xf32>,
    return
  }
  func.func @transform_0(%arg0: i32) -> (i32, i32) {
    %c0_i32 = arith.constant 0 : i32
    %c0_i32_0 = arith.constant 0 : i32
    return %arg0, %c0_i32 : i32, i32
  }
  func.func @transform_1(%arg0: i32) -> (i32, i32) {
    %c0_i32 = arith.constant 0 : i32
    %c0_i32_0 = arith.constant 0 : i32
    return %arg0, %c0_i32 : i32, i32
  }
  func.func @transform_2(%arg0: i32) -> (i32, i32) {
    %c0_i32 = arith.constant 0 : i32
    %c0_i32_0 = arith.constant 0 : i32
    %c0_i32_1 = arith.constant 0 : i32
    return %c0_i32, %c0_i32_0 : i32, i32
  }
  func.func @transform_3(%arg0: i32) -> (i32, i32) {
    %c0_i32 = arith.constant 0 : i32
    %c0_i32_0 = arith.constant 0 : i32
    %c0_i32_1 = arith.constant 0 : i32
    return %c0_i32, %c0_i32_0 : i32, i32
  }
  func.func @transform_4(%arg0: i32) -> (i32, i32) {
    %c0_i32 = arith.constant 0 : i32
    %c0_i32_0 = arith.constant 0 : i32
    %c0_i32_1 = arith.constant 0 : i32
    return %c0_i32, %c0_i32_0 : i32, i32
  }
  func.func @transform_5(%arg0: i32) -> (i32, i32) {
    %c0_i32 = arith.constant 0 : i32
    %c0_i32_0 = arith.constant 0 : i32
    %c0_i32_1 = arith.constant 0 : i32
    return %c0_i32, %c0_i32_0 : i32, i32
  }
  func.func @transform_6(%arg0: i32) -> (i32, i32) {
    %c0_i32 = arith.constant 0 : i32
    %c0_i32_0 = arith.constant 0 : i32
    %c0_i32_1 = arith.constant 0 : i32
    return %c0_i32, %c0_i32_0 : i32, i32
  }
  func.func @transform_7(%arg0: i32) -> (i32, i32) {
    %c0_i32 = arith.constant 0 : i32
    %c0_i32_0 = arith.constant 0 : i32
    %c0_i32_1 = arith.constant 0 : i32
    return %c0_i32, %c0_i32_0 : i32, i32
  }
  func.func @transform_8(%arg0: i32) -> (i32, i32) {
    %c0_i32 = arith.constant 0 : i32
    %c0_i32_0 = arith.constant 0 : i32
    %c0_i32_1 = arith.constant 0 : i32
    return %c0_i32, %c0_i32_0 : i32, i32
  }
  func.func @transform_9(%arg0: i32) -> (i32, i32) {
    %c0_i32 = arith.constant 0 : i32
    %c0_i32_0 = arith.constant 0 : i32
    return %arg0, %c0_i32 : i32, i32
  }
}

</mosaic_0001>

<bundles_post_ra>
// kernel: tpu_custom_call.1
= control target key start
LH: loop header
LB: loop body
LE: loop exit
PB: predicated region body
PF: predicated region fallthrough
CT: control target
= control target key end

     0   :  { %15 = vsyncpa [#allocation4], 0  ;;  %s519_s0 = inlined_call_operand.hbm [shape: bf16[8,16], index: 0, kind: input, shape index: {}]   ;;  %s520_s1 = inlined_call_operand.vmem [shape: bf16[8,16], index: 1, kind: input, shape index: {}]   ;;  %s521_s2 = inlined_call_operand.hbm [shape: bf16[16,32], index: 2, kind: input, shape index: {}]   ;;  %s522_s3 = inlined_call_operand.hbm [shape: bf16[16,32], index: 3, kind: input, shape index: {}]   ;;  %s523_s4 = inlined_call_operand.vmem [shape: f32[1,32], index: 4, kind: input, shape index: {}]   ;;  %s524_s5 = inlined_call_operand.vmem [shape: bf16[32,32], index: 5, kind: input, shape index: {}]   ;;  %s525_s6 = inlined_call_operand.vmem [shape: f32[1,32], index: 6, kind: input, shape index: {}]   ;;  %s526_s7 = inlined_call_operand.vmem [shape: bf16[1,32], index: 7, kind: input, shape index: {}]   ;;  %s527_s8 = inlined_call_operand.<no memory space> [shape: f32[1,1], index: 8, kind: input, shape index: {}]   ;;  %s528_s9 = inlined_call_operand.vmem [shape: f32[8,1], index: 9, kind: output, shape index: {}]  }
   0x1   :  { %16 = vsyncpa [#allocation6], 0  ;;  %s394_s30 = smov [#allocation5]   ;;  %s324_s13 = scalar_lea.hbm %s521_s2, 128 }
   0x2   :  { %s34_s10 = sshll.u32 %s394_s30, 4  ;;  %p325_p0 = scmp.ne.s32.totalorder %s521_s2, %s324_s13  ;;  %s35_s10 = int_to_ptr.vmem [resolvable:$true] %s34_s10 }
   0x3   :  { %p328_p1 = scmp.lt.u32.totalorder %s324_s13, %s521_s2 }
   0x5   :  { %p330_p2 = pnand %p328_p1, %p325_p0 }
   0x7   :  { %333 = shalt.err (!%p330_p2)
}
   0x8   :  { %s334_s18 = scalar_lea.vmem %s35_s10, 128  ;;  %p339_p4 = scmp.lt.s32.totalorder %s35_s10, %s35_s10 }
   0x9   :  { %p335_p3 = scmp.ne.s32.totalorder %s35_s10, %s334_s18  ;;  %p340_p5 = scmp.lt.s32.totalorder %s334_s18, %s334_s18 }
   0xb   :  { %p341_p6 = por %p340_p5, %p339_p4 }
   0xd   :  { %p342_p7 = pnand %p341_p6, %p335_p3 }
   0xf   :  { %345 = shalt.err (!%p342_p7)
}
  0x10   :  { %s395_s19 = smov 64   ;;  %s396_s20 = smov 4  }
  0x11   :  { %40 = dma.hbm_to_vmem [thread:$0]  %s521_s2, 128, %s35_s10, [#allocation6], %s395_s19, %s395_s19, %s396_s20  }
  0x12   :  { %s397_s23 = smov [#allocation3]   ;;  %s398_s25 = smov [#allocation7]  }
  0x13   :  { %s23_s24 = sshll.u32 %s397_s23, 4  ;;  %s46_s26 = sshll.u32 %s398_s25, 4  ;;  %s24_s24 = int_to_ptr.vmem [resolvable:$true] %s23_s24  ;;  %s47_s26 = int_to_ptr.vmem [resolvable:$true] %s46_s26 }
  0x14   :  { %s346_s29 = scalar_lea.hbm %s519_s0, 64 }
  0x15   :  { %p347_p8 = scmp.ne.s32.totalorder %s519_s0, %s346_s29  ;;  %p350_p9 = scmp.lt.u32.totalorder %s346_s29, %s519_s0 }
  0x17   :  { %p352_p10 = pnand %p350_p9, %p347_p8 }
  0x19   :  { %355 = shalt.err (!%p352_p10)
}
  0x1a   :  { %s356_s2 = scalar_lea.vmem %s24_s24, 64  ;;  %p361_p12 = scmp.lt.s32.totalorder %s24_s24, %s24_s24 }
  0x1b   :  { %p357_p11 = scmp.ne.s32.totalorder %s24_s24, %s356_s2  ;;  %p362_p13 = scmp.lt.s32.totalorder %s356_s2, %s356_s2 }
  0x1d   :  { %p363_p0 = por %p362_p13, %p361_p12 }
  0x1f   :  { %p364_p1 = pnand %p363_p0, %p357_p11 }
  0x21   :  { %367 = shalt.err (!%p364_p1)
}
  0x22   :  { %26 = dma.hbm_to_vmem [thread:$0]  %s519_s0, 64, %s24_s24, [#allocation4]  }
  0x23   :  { %s368_s17 = scalar_lea.hbm %s522_s3, 128 }
  0x24   :  { %p369_p2 = scmp.ne.s32.totalorder %s522_s3, %s368_s17  ;;  %p372_p3 = scmp.lt.u32.totalorder %s368_s17, %s522_s3 }
  0x26   :  { %p374_p4 = pnand %p372_p3, %p369_p2 }
  0x28   :  { %377 = shalt.err (!%p374_p4)
}
  0x29   :  { %s378_s25 = scalar_lea.vmem %s47_s26, 128  ;;  %p383_p6 = scmp.lt.s32.totalorder %s47_s26, %s47_s26 }
  0x2a   :  { %p379_p5 = scmp.ne.s32.totalorder %s47_s26, %s378_s25  ;;  %p384_p7 = scmp.lt.s32.totalorder %s378_s25, %s378_s25 }
  0x2c   :  { %p385_p8 = por %p384_p7, %p383_p6 }
  0x2e   :  { %p386_p9 = pnand %p385_p8, %p379_p5 }
  0x30   :  { %389 = shalt.err (!%p386_p9)
}
  0x31   :  { %52 = dma.hbm_to_vmem [thread:$0]  %s522_s3, 128, %s47_s26, [#allocation6], %s395_s19, %s395_s19, %s396_s20  }
  0x32   :  { %390 = dma.done.wait [#allocation4], 64  }
  0x33   :  { %391 = vsyncadd [#allocation4], 4294967232 }
  0x34   :  { %392 = dma.done.wait [#allocation6], 256  }
  0x35   :  { %393 = vsyncadd [#allocation6], 4294967040  ;;  %v399_v0 = vmov 0.0   ;;  %vm400_vm0 = vmmov 0   ;;  %v320_v1 = vld [vmem:[#allocation7] sm:$0xff]   ;;  %v321_v2 = vld [vmem:[#allocation5] sm:$0xff]   ;;  %v258_v20 = vlaneseq  ;;  %v267_v35 = vstv %s527_s8 }
  0x36   :  { %293 = vmatprep.subr.bf16.mxu0 %v399_v0  ;;  %299 = vmatprep.subr.bf16.mxu1 %v399_v0  ;;  %vm85_vm1 = vcmask 130048   ;;  %v76_v3 = vld [vmem:[%s520_s1] sm:$0xf]  ;;  %v323_v6 = vld [vmem:[%s524_s5 + $0x8] sm:$0xff]   ;;  %vm211_vm2 = vcmask 261120   ;;  %vm269_vm3 = vcmask 7168  }
  0x37   :  { %295 = vmatprep.mubr.msk.bf16.mxu0 %vm400_vm0, %v399_v0  ;;  %301 = vmatprep.mubr.msk.bf16.mxu1 %vm400_vm0, %v399_v0  ;;  %v73_v4 = vld [vmem:[#allocation3] sm:$0xf]  ;;  %v259_v21 = vshrl.u32 %v258_v20, 7 }
  0x38   :  { %294 = vmatpush3.bf16.msra.mxu0 %v320_v1  ;;  %300 = vmatpush3.bf16.msra.mxu1 %v321_v2  ;;  %v322_v5 = vld [vmem:[%s524_s5] sm:$0xff]  }
  0x39   :  { %305 = vmatprep.subr.bf16.mxu0 %v399_v0  ;;  %v281_v9 = vld [vmem:[%s523_s4] ss:$0 sm:$0xff]  ;;  %v260_v24 = vsub.s32 0, %v259_v21 }
  0x3a   :  { %v256_v22 = vld [vmem:[%s526_s7] sm:$0x1] }
  0x3b   :  { %296 = vmatmul.mubr.msk.bf16.vlgmr.msra.gmra.mrb[0].mxu0 %vm85_vm1, %v76_v3  ;;  %302 = vmatmul.mubr.msk.bf16.vlgmr.msra.gmra.mrb[0].mxu1 %vm85_vm1, %v73_v4  ;;  %v257_v23 = vunpack.c.l.bf16 %v256_v22  ;;  %v282_v25 = vld [vmem:[%s525_s6] ss:$0 sm:$0xff] }
  0x3c   :  { %309 = vmatprep.mubr.msk.bf16.mxu0 %vm400_vm0, %v399_v0  ;;  %306 = vmatpush3.bf16.msra.mxu0 %v322_v5 }
  0x3d   :  { %307 = vmatprep.subr.bf16.mxu0 %v399_v0  ;;  %v261_v29 = vrot.slane %v257_v23, %v260_v24 }
  0x40   :  { %308 = vmatpush3.bf16.msra.mxu0 %v323_v6 }
 0x10e   :  { %v123_v7 = vpop.f32.mrb[0].mxu0  ;;  %v172_v8 = vpop.f32.mrb[0].mxu1 }
 0x10f   :  { %v297_v10 = vpop.f32.mrb[1].mxu0  ;;  %v173_v11 = vadd.f32 %v172_v8, %v123_v7  ;;  %v303_v12 = vpop.f32.mrb[1].mxu1 }
 0x110   :  { %v126_v13 = vpop.f32.mrb[2].mxu0  ;;  %v175_v14 = vpop.f32.mrb[2].mxu1 }
 0x111   :  { %v298_v15 = vpop.f32.mrb[3].mxu0  ;;  %v185_v16 = vadd.f32 %v281_v9, %v173_v11  ;;  %v304_v17 = vpop.f32.mrb[3].mxu1 }
 0x113   :  { %v186_v18 = vmax.f32 %v185_v16, 0.0 }
 0x115   :  { %v187_v19 = vpack.c.bf16 %v186_v18, %v186_v18 }
 0x117   :  { %310 = vmatmul.mubr.msk.bf16.vlgmr.msra.gmra.mrb[4].mxu0 %vm211_vm2, %v187_v19 }
 0x1ea   :  { %v249_v26 = vpop.f32.mrb[4].mxu0 }
 0x1eb   :  { %v250_v27 = vadd.f32 %v282_v25, %v249_v26  ;;  %v311_v28 = vpop.f32.mrb[5].mxu0 }
 0x1ec   :  { %v252_v30 = vpop.f32.mrb[6].mxu0 }
 0x1ed   :  { %v255_v31 = vmax.f32 %v250_v27, 0.0  ;;  %v312_v32 = vpop.f32.mrb[7].mxu0 }
 0x1ef   :  { %v262_v33 = vmul.f32 %v261_v29, %v255_v31 }
 0x1f1   :  { %v263_v34 = vsel %vm211_vm2, %v262_v33, 0.0 }
 0x1f2   :  { %264 = vadd.xlane.f32.xlu0 %v263_v34 }
 0x27f   :  { %v265_v36 = vpop.xlane.xlu0 %264 }
 0x280   :  { %v268_v37 = vadd.f32 %v267_v35, %v265_v36 }
 0x282   :  { %270 = vst.msk [vmem:[%s528_s9] sm:$0xff] %vm269_vm3, %v268_v37 }
 0x283   :  { %275 = vsyncpa [#allocation4], 1 }
 0x284   :  { %276 = vsyncpa [#allocation6], 1 }

</bundles_post_ra>
